<compile_context>
chip_gen: v6e
topology: v6e:2x2x1
jax: 0.10.0
libtpu: 0.0.40
codegen_flags: <defaults>
</compile_context>

<pallas_src>
import functools

import numpy as np
import jax
import jax.numpy as jnp
from jax.experimental import pallas as pl
from jax.experimental.pallas import tpu as pltpu


# ----------------------------------------------------------------------------
# static helpers (glue only, no tensor compute)
# ----------------------------------------------------------------------------
def build_kernel_sizes(pooling_counts):
    """Kernel sizes of the sequential MaxPool1d chain (stride is always 1)."""
    ks = [2] * pooling_counts[0]
    for i in range(1, len(pooling_counts)):
        ks.extend([2 * i + 1] * pooling_counts[i])
    return tuple(ks)


def build_mask2d(pooling_counts, N):
    """Static boolean validity mask, identical to SparseMaxPool.mask2d."""
    mask = np.zeros((N, N), dtype=bool)
    mask[np.arange(N), np.arange(N)] = True
    stride, offset = 1, 0
    for c in pooling_counts:
        for _ in range(c):
            offset += stride
            i = np.arange(0, N - offset)
            mask[i, i + offset] = True
        stride *= 2
    return jnp.asarray(mask)


# ----------------------------------------------------------------------------
# in-kernel helpers
# ----------------------------------------------------------------------------
def _window_max(m, k, N):
    """Sliding max over k consecutive rows: out[i] = max(m[i], ..., m[i+k-1]).

    Log-step: ceil(log2 k) XLU rolls + VPU maxes instead of k-1 shifts.
    Rows that would read past the valid prefix pick up wrapped-around (finite,
    junk) values; they are never selected by any band mask (every later band
    offset exceeds the junk row index bound), which reproduces the shrinking-
    sequence semantics of the PyTorch MaxPool1d chain.
    """
    if k <= 1:
        return m
    w = 1
    while 2 * w < k:
        # roll by -w  (shift N - w == -w mod N):  rolled[i] = m[i + w]
        m = jnp.maximum(m, pltpu.roll(m, shift=N - w, axis=0))
        w *= 2
    s = k - w                      # 1 <= s <= w; combined window width is k
    return jnp.maximum(m, pltpu.roll(m, shift=N - s, axis=0))


def _agg_center_kernel(x_ref, map_ref, *, kernel_sizes, N, D):
    """x_ref: (Bblk, N, D) -> map_ref: (Bblk, N, N*D) (lane-dense minor dim).

    map_ref[b, i, j*D + d] == map2d_c[b, i, j, d] of the PyTorch module (i.e.
    already in the post-permute (B, N, N, D) order); the wrapper only splits
    the contiguous minor dim, which moves no data.
    """
    bblk = x_ref.shape[0]
    nd = N * D

    # band[i, j*D + d] = j - i  (built once; one scalar compare per band)
    col = jax.lax.broadcasted_iota(jnp.int32, (N, nd), 1)
    row = jax.lax.broadcasted_iota(jnp.int32, (N, nd), 0)
    if D & (D - 1) == 0:                        # power-of-two D -> cheap shift
        jblk = col >> (int(D).bit_length() - 1)
    else:
        jblk = col // D
    band = jblk - row

    zero = jnp.zeros((), dtype=x_ref.dtype)

    for b in range(bblk):                       # bblk is small and static
        # Lane-replicated sequence: cur[i, j*D + d] = x[b, i, d] for every j.
        # Replicated once per batch element; all later work is full-vreg-width.
        cur = jnp.tile(x_ref[b], (1, N))        # (N, N*D)

        # diagonal: map2d[i, i, :] = x[i, :]
        acc = jnp.where(band == 0, cur, zero)

        offset = 0
        for k in kernel_sizes:                  # static unrolled pooling chain
            cur = _window_max(cur, k, N)
            offset += k - 1
            # band write: map2d[i, i + offset, :] = cur[i, :]  (i < N - offset)
            acc = jnp.where(band == offset, cur, acc)

        map_ref[b] = acc


# ----------------------------------------------------------------------------
# wrapper
# ----------------------------------------------------------------------------
def aggregation_center(hidden_c, pooling_counts):
    """hidden_c: (B, N, D) float. Returns (map2d_c (B,N,N,D), mask2d (N,N))."""
    B, N, D = hidden_c.shape
    kernel_sizes = build_kernel_sizes(pooling_counts)
    kernel = functools.partial(
        _agg_center_kernel, kernel_sizes=kernel_sizes, N=N, D=D)

    out_shape = jax.ShapeDtypeStruct((B, N, N * D), hidden_c.dtype)
    out_bytes = B * N * N * D * np.dtype(hidden_c.dtype).itemsize

    if out_bytes <= (8 << 20):
        # Small problem (the config here is 64 KiB total): fold the whole batch
        # into ONE kernel invocation -- on v5e/v6e the grid is a serial loop on
        # a single TensorCore, so per-grid-step overhead (~0.35 us) is pure loss.
        map_flat = pl.pallas_call(kernel, out_shape=out_shape)(hidden_c)
    else:
        # Larger problems: one batch element per "parallel" grid step so v7x can
        # shard the batch across its two TensorCores and the output block is
        # pipelined instead of fully resident.
        # TODO(synk): for very large N also tile the first N (row) axis so the
        # (1, N, N*D) output block stays within the scoped VMEM limit.
        map_flat = pl.pallas_call(
            kernel,
            out_shape=out_shape,
            grid=(B,),
            in_specs=[pl.BlockSpec((1, N, D), lambda b: (b, 0, 0))],
            out_specs=pl.BlockSpec((1, N, N * D), lambda b: (b, 0, 0)),
            compiler_params=pltpu.CompilerParams(
                dimension_semantics=("parallel",)),
        )(hidden_c)

    map2d_c = map_flat.reshape(B, N, N, D)      # contiguous split; no data move
    mask2d = build_mask2d(pooling_counts, N)
    return map2d_c, mask2d


# ----------------------------------------------------------------------------
# Pure-JAX reference (mirrors the PyTorch forward) for a correctness check.
# ----------------------------------------------------------------------------
def reference(hidden_c, pooling_counts):
    B, N, D = hidden_c.shape
    kernel_sizes = build_kernel_sizes(pooling_counts)
    x = hidden_c                                  # pool over axis 1
    map2d = jnp.zeros((B, N, N, D), hidden_c.dtype)
    idx = jnp.arange(N)
    map2d = map2d.at[:, idx, idx, :].set(x)
    offset = 0
    for k in kernel_sizes:
        L = x.shape[1]
        newx = x[:, : L - k + 1]
        for s in range(1, k):
            newx = jnp.maximum(newx, x[:, s: L - k + 1 + s])
        x = newx
        offset += k - 1
        i = jnp.arange(N - offset)
        map2d = map2d.at[:, i, i + offset, :].set(x)
    return map2d, build_mask2d(pooling_counts, N)


if __name__ == "__main__":
    # config.model.video_seq_len = 16, config.model.pooling_counts = [3, 2],
    # config.vilt.fuse_dim = 32 (SparseMaxPool has no learnable parameters).
    B, N, D = 2, 16, 32
    pooling_counts = [3, 2]

    key = jax.random.PRNGKey(0)
    hidden_c = jax.random.normal(key, (B, N, D), dtype=jnp.float32)

    map2d_c, mask2d = aggregation_center(hidden_c, pooling_counts)
    map2d_c = jax.block_until_ready(map2d_c)
    mask2d = jax.block_until_ready(mask2d)

    ref_map, ref_mask = reference(hidden_c, pooling_counts)
    np.testing.assert_allclose(np.asarray(map2d_c), np.asarray(ref_map),
                               rtol=1e-6, atol=1e-6)
    np.testing.assert_array_equal(np.asarray(mask2d), np.asarray(ref_mask))

    print("KERNEL_OK")
</pallas_src>

<mosaic_0001>
module attributes {stable_mosaic.version = 11 : i64} {
  func.func @_agg_center_kernel(%arg0: memref<2x16x32xf32, #tpu.memory_space<vmem>>, %arg1: memref<2x16x512xf32, #tpu.memory_space<vmem>>) attributes {dimension_semantics = [], scalar_prefetch = 0 : i64, scratch_operands = 0 : i64, tpu.core_type = #tpu.core_type<tc>} {
    %0 = tpu.iota {dimensions = array<i32: 1>} : vector<16x512xi32>
    %1 = tpu.iota {dimensions = array<i32: 0>} : vector<16x512xi32>
    %c5_i32 = arith.constant 5 : i32
    %2 = vector.broadcast %c5_i32 : i32 to vector<16x512xi32>
    %3 = arith.shrsi %0, %2 : vector<16x512xi32>
    %4 = arith.subi %3, %1 : vector<16x512xi32>
    %c0 = arith.constant 0 : index
    %c0_0 = arith.constant 0 : index
    %c0_1 = arith.constant 0 : index
    %5 = vector.load %arg0[%c0, %c0_0, %c0_1] : memref<2x16x32xf32, #tpu.memory_space<vmem>>, vector<1x16x32xf32>
    %6 = vector.shape_cast %5 : vector<1x16x32xf32> to vector<16x32xf32>
    %7 = tpu.concatenate %6, %6, %6, %6, %6, %6, %6, %6, %6, %6, %6, %6, %6, %6, %6, %6 in 1 : vector<16x32xf32>, vector<16x32xf32>, vector<16x32xf32>, vector<16x32xf32>, vector<16x32xf32>, vector<16x32xf32>, vector<16x32xf32>, vector<16x32xf32>, vector<16x32xf32>, vector<16x32xf32>, vector<16x32xf32>, vector<16x32xf32>, vector<16x32xf32>, vector<16x32xf32>, vector<16x32xf32>, vector<16x32xf32> -> vector<16x512xf32>
    %c0_i32 = arith.constant 0 : i32
    %8 = vector.broadcast %c0_i32 : i32 to vector<16x512xi32>
    %9 = arith.cmpi eq, %4, %8 : vector<16x512xi32>
    %cst = arith.constant 0.000000e+00 : f32
    %10 = vector.broadcast %cst : f32 to vector<16x512xf32>
    %11 = arith.select %9, %7, %10 : vector<16x512xi1>, vector<16x512xf32>
    %c15_i32 = arith.constant 15 : i32
    %12 = tpu.dynamic_rotate %7 by %c15_i32 dim 0 : vector<16x512xf32>, i32 -> vector<16x512xf32>
    %13 = arith.maximumf %7, %12 : vector<16x512xf32>
    %c1_i32 = arith.constant 1 : i32
    %14 = vector.broadcast %c1_i32 : i32 to vector<16x512xi32>
    %15 = arith.cmpi eq, %4, %14 : vector<16x512xi32>
    %16 = arith.select %15, %13, %11 : vector<16x512xi1>, vector<16x512xf32>
    %c15_i32_2 = arith.constant 15 : i32
    %17 = tpu.dynamic_rotate %13 by %c15_i32_2 dim 0 : vector<16x512xf32>, i32 -> vector<16x512xf32>
    %18 = arith.maximumf %13, %17 : vector<16x512xf32>
    %c2_i32 = arith.constant 2 : i32
    %19 = vector.broadcast %c2_i32 : i32 to vector<16x512xi32>
    %20 = arith.cmpi eq, %4, %19 : vector<16x512xi32>
    %21 = arith.select %20, %18, %16 : vector<16x512xi1>, vector<16x512xf32>
    %c15_i32_3 = arith.constant 15 : i32
    %22 = tpu.dynamic_rotate %18 by %c15_i32_3 dim 0 : vector<16x512xf32>, i32 -> vector<16x512xf32>
    %23 = arith.maximumf %18, %22 : vector<16x512xf32>
    %c3_i32 = arith.constant 3 : i32
    %24 = vector.broadcast %c3_i32 : i32 to vector<16x512xi32>
    %25 = arith.cmpi eq, %4, %24 : vector<16x512xi32>
    %26 = arith.select %25, %23, %21 : vector<16x512xi1>, vector<16x512xf32>
    %c15_i32_4 = arith.constant 15 : i32
    %27 = tpu.dynamic_rotate %23 by %c15_i32_4 dim 0 : vector<16x512xf32>, i32 -> vector<16x512xf32>
    %28 = arith.maximumf %23, %27 : vector<16x512xf32>
    %c15_i32_5 = arith.constant 15 : i32
    %29 = tpu.dynamic_rotate %28 by %c15_i32_5 dim 0 : vector<16x512xf32>, i32 -> vector<16x512xf32>
    %30 = arith.maximumf %28, %29 : vector<16x512xf32>
    %c5_i32_6 = arith.constant 5 : i32
    %31 = vector.broadcast %c5_i32_6 : i32 to vector<16x512xi32>
    %32 = arith.cmpi eq, %4, %31 : vector<16x512xi32>
    %33 = arith.select %32, %30, %26 : vector<16x512xi1>, vector<16x512xf32>
    %c15_i32_7 = arith.constant 15 : i32
    %34 = tpu.dynamic_rotate %30 by %c15_i32_7 dim 0 : vector<16x512xf32>, i32 -> vector<16x512xf32>
    %35 = arith.maximumf %30, %34 : vector<16x512xf32>
    %c15_i32_8 = arith.constant 15 : i32
    %36 = tpu.dynamic_rotate %35 by %c15_i32_8 dim 0 : vector<16x512xf32>, i32 -> vector<16x512xf32>
    %37 = arith.maximumf %35, %36 : vector<16x512xf32>
    %c7_i32 = arith.constant 7 : i32
    %38 = vector.broadcast %c7_i32 : i32 to vector<16x512xi32>
    %39 = arith.cmpi eq, %4, %38 : vector<16x512xi32>
    %40 = arith.select %39, %37, %33 : vector<16x512xi1>, vector<16x512xf32>
    %c0_9 = arith.constant 0 : index
    %c0_10 = arith.constant 0 : index
    %c0_11 = arith.constant 0 : index
    %41 = vector.load %arg1[%c0_9, %c0_10, %c0_11] : memref<2x16x512xf32, #tpu.memory_space<vmem>>, vector<1x16x512xf32>
    %42 = vector.shape_cast %41 : vector<1x16x512xf32> to vector<16x512xf32>
    %43 = vector.shape_cast %40 : vector<16x512xf32> to vector<1x16x512xf32>
    tpu.vector_store %arg1[%c0_9, %c0_10, %c0_11], %43 {strides = array<i32>} : memref<2x16x512xf32, #tpu.memory_space<vmem>>, vector<1x16x512xf32>,
    %c1 = arith.constant 1 : index
    %c0_12 = arith.constant 0 : index
    %c0_13 = arith.constant 0 : index
    %44 = vector.load %arg0[%c1, %c0_12, %c0_13] : memref<2x16x32xf32, #tpu.memory_space<vmem>>, vector<1x16x32xf32>
    %45 = vector.shape_cast %44 : vector<1x16x32xf32> to vector<16x32xf32>
    %46 = tpu.concatenate %45, %45, %45, %45, %45, %45, %45, %45, %45, %45, %45, %45, %45, %45, %45, %45 in 1 : vector<16x32xf32>, vector<16x32xf32>, vector<16x32xf32>, vector<16x32xf32>, vector<16x32xf32>, vector<16x32xf32>, vector<16x32xf32>, vector<16x32xf32>, vector<16x32xf32>, vector<16x32xf32>, vector<16x32xf32>, vector<16x32xf32>, vector<16x32xf32>, vector<16x32xf32>, vector<16x32xf32>, vector<16x32xf32> -> vector<16x512xf32>
    %c0_i32_14 = arith.constant 0 : i32
    %47 = vector.broadcast %c0_i32_14 : i32 to vector<16x512xi32>
    %48 = arith.cmpi eq, %4, %47 : vector<16x512xi32>
    %cst_15 = arith.constant 0.000000e+00 : f32
    %49 = vector.broadcast %cst_15 : f32 to vector<16x512xf32>
    %50 = arith.select %48, %46, %49 : vector<16x512xi1>, vector<16x512xf32>
    %c15_i32_16 = arith.constant 15 : i32
    %51 = tpu.dynamic_rotate %46 by %c15_i32_16 dim 0 : vector<16x512xf32>, i32 -> vector<16x512xf32>
    %52 = arith.maximumf %46, %51 : vector<16x512xf32>
    %c1_i32_17 = arith.constant 1 : i32
    %53 = vector.broadcast %c1_i32_17 : i32 to vector<16x512xi32>
    %54 = arith.cmpi eq, %4, %53 : vector<16x512xi32>
    %55 = arith.select %54, %52, %50 : vector<16x512xi1>, vector<16x512xf32>
    %c15_i32_18 = arith.constant 15 : i32
    %56 = tpu.dynamic_rotate %52 by %c15_i32_18 dim 0 : vector<16x512xf32>, i32 -> vector<16x512xf32>
    %57 = arith.maximumf %52, %56 : vector<16x512xf32>
    %c2_i32_19 = arith.constant 2 : i32
    %58 = vector.broadcast %c2_i32_19 : i32 to vector<16x512xi32>
    %59 = arith.cmpi eq, %4, %58 : vector<16x512xi32>
    %60 = arith.select %59, %57, %55 : vector<16x512xi1>, vector<16x512xf32>
    %c15_i32_20 = arith.constant 15 : i32
    %61 = tpu.dynamic_rotate %57 by %c15_i32_20 dim 0 : vector<16x512xf32>, i32 -> vector<16x512xf32>
    %62 = arith.maximumf %57, %61 : vector<16x512xf32>
    %c3_i32_21 = arith.constant 3 : i32
    %63 = vector.broadcast %c3_i32_21 : i32 to vector<16x512xi32>
    %64 = arith.cmpi eq, %4, %63 : vector<16x512xi32>
    %65 = arith.select %64, %62, %60 : vector<16x512xi1>, vector<16x512xf32>
    %c15_i32_22 = arith.constant 15 : i32
    %66 = tpu.dynamic_rotate %62 by %c15_i32_22 dim 0 : vector<16x512xf32>, i32 -> vector<16x512xf32>
    %67 = arith.maximumf %62, %66 : vector<16x512xf32>
    %c15_i32_23 = arith.constant 15 : i32
    %68 = tpu.dynamic_rotate %67 by %c15_i32_23 dim 0 : vector<16x512xf32>, i32 -> vector<16x512xf32>
    %69 = arith.maximumf %67, %68 : vector<16x512xf32>
    %c5_i32_24 = arith.constant 5 : i32
    %70 = vector.broadcast %c5_i32_24 : i32 to vector<16x512xi32>
    %71 = arith.cmpi eq, %4, %70 : vector<16x512xi32>
    %72 = arith.select %71, %69, %65 : vector<16x512xi1>, vector<16x512xf32>
    %c15_i32_25 = arith.constant 15 : i32
    %73 = tpu.dynamic_rotate %69 by %c15_i32_25 dim 0 : vector<16x512xf32>, i32 -> vector<16x512xf32>
    %74 = arith.maximumf %69, %73 : vector<16x512xf32>
    %c15_i32_26 = arith.constant 15 : i32
    %75 = tpu.dynamic_rotate %74 by %c15_i32_26 dim 0 : vector<16x512xf32>, i32 -> vector<16x512xf32>
    %76 = arith.maximumf %74, %75 : vector<16x512xf32>
    %c7_i32_27 = arith.constant 7 : i32
    %77 = vector.broadcast %c7_i32_27 : i32 to vector<16x512xi32>
    %78 = arith.cmpi eq, %4, %77 : vector<16x512xi32>
    %79 = arith.select %78, %76, %72 : vector<16x512xi1>, vector<16x512xf32>
    %c1_28 = arith.constant 1 : index
    %c0_29 = arith.constant 0 : index
    %c0_30 = arith.constant 0 : index
    %80 = vector.load %arg1[%c1_28, %c0_29, %c0_30] : memref<2x16x512xf32, #tpu.memory_space<vmem>>, vector<1x16x512xf32>
    %81 = vector.shape_cast %80 : vector<1x16x512xf32> to vector<16x512xf32>
    %82 = vector.shape_cast %79 : vector<16x512xf32> to vector<1x16x512xf32>
    tpu.vector_store %arg1[%c1_28, %c0_29, %c0_30], %82 {strides = array<i32>} : memref<2x16x512xf32, #tpu.memory_space<vmem>>, vector<1x16x512xf32>,
    return
  }
}

</mosaic_0001>

<bundles_post_ra>
// kernel: tpu_custom_call.1
= control target key start
LH: loop header
LB: loop body
LE: loop exit
PB: predicated region body
PF: predicated region fallthrough
CT: control target
= control target key end

     0   :  { %6 = vsyncpa [#allocation3], 0  ;;  %s915_s0 = inlined_call_operand.hbm [shape: f32[2,16,32], index: 0, kind: input, shape index: {}]   ;;  %s916_s1 = inlined_call_operand.hbm [shape: f32[2,16,512], index: 1, kind: output, shape index: {}]  }
   0x1   :  { %7 = vsyncpa [#allocation4], 0  ;;  %s418_s6 = smov [#allocation2]  }
   0x2   :  { %s13_s7 = sshll.u32 %s418_s6, 4  ;;  %s14_s7 = int_to_ptr.vmem [resolvable:$true] %s13_s7 }
   0x3   :  { %s382_s8 = scalar_lea.vmem %s14_s7, 512  ;;  %p387_p1 = scmp.lt.s32.totalorder %s14_s7, %s14_s7 }
   0x4   :  { %p383_p0 = scmp.ne.s32.totalorder %s14_s7, %s382_s8  ;;  %p388_p2 = scmp.lt.s32.totalorder %s382_s8, %s382_s8 }
   0x6   :  { %p389_p3 = por %p388_p2, %p387_p1 }
   0x8   :  { %p390_p4 = pnand %p389_p3, %p383_p0 }
   0xa   :  { %393 = shalt.err (!%p390_p4)
}
   0xb   :  { %s419_s9 = smov 128   ;;  %s420_s10 = smov 8  }
   0xc   :  { %19 = dma.hbm_to_vmem [thread:$0]  %s915_s0, 512, %s14_s7, [#allocation3], %s419_s9, %s419_s9, %s420_s10  }
   0xd   :  { %414 = dma.done.wait [#allocation3], 512  }
   0xe   :  { %415 = vsyncadd [#allocation3], 4294966784  ;;  %v222_v0 = vld [vmem:[#allocation2 + $0x10] sm:$0xff]  ;;  %v43_v1 = vld [vmem:[#allocation2] sm:$0xff]  ;;  %s421_s13 = smov 32   ;;  %s422_s14 = smov 64   ;;  %v23_v12 = vlaneseq }
   0xf   :  { %226 = vrot.lane.b32.xlu1 %v222_v0, %s421_s13  ;;  %47 = vrot.lane.b32.xlu0 %v43_v1, %s421_s13  ;;  %v223_v2 = vld [vmem:[#allocation2 + $0x18] sm:$0xff]  ;;  %v44_v3 = vld [vmem:[#allocation2 + $0x8] sm:$0xff]  ;;  %s423_s0 = smov 96   ;;  %vm65_vm0 = vcmask 261120   ;;  %vm68_vm1 = vcmask 523264   ;;  %vm71_vm2 = vcmask 785408  }
  0x10   :  { %v24_v19 = vand.u32 127, %v23_v12  ;;  %v447_v20 = vshrl.u32 %v23_v12, 7  ;;  %s424_s15 = smov [#allocation5]  }
  0x11   :  { %s354_s16 = sshll.u32 %s424_s15, 4  ;;  %s355_s16 = int_to_ptr.vmem [resolvable:$true] %s354_s16 }
  0x12   :  { %vm92_vm3 = vcmp.lt.s32.totalorder %v447_v20, 7  ;;  %v25_v27 = vadd.s32 128, %v24_v19  ;;  %v26_v28 = vadd.s32 256, %v24_v19  ;;  %v27_v29 = vadd.s32 384, %v24_v19  ;;  %s394_s17 = scalar_lea.vmem %s355_s16, 2048  ;;  %p399_p6 = scmp.lt.s32.totalorder %s355_s16, %s355_s16 }
  0x13   :  { %228 = vrot.lane.b32.xlu1 %v223_v2, %s421_s13  ;;  %49 = vrot.lane.b32.xlu0 %v44_v3, %s421_s13  ;;  %v30_v40 = vadd.s32 8, %v447_v20  ;;  %v31_v41 = vshra.s32 %v24_v19, 5  ;;  %p395_p5 = scmp.ne.s32.totalorder %s355_s16, %s394_s17  ;;  %p400_p7 = scmp.lt.s32.totalorder %s394_s17, %s394_s17 }
  0x14   :  { %v32_v42 = vshra.s32 %v25_v27, 5  ;;  %v33_v43 = vshra.s32 %v26_v28, 5  ;;  %v34_v45 = vshra.s32 %v27_v29, 5 }
  0x15   :  { %v497_v55 = vsub.s32 %v31_v41, %v30_v40  ;;  %v506_v59 = vsub.s32 %v31_v41, %v447_v20  ;;  %p401_p8 = por %p400_p7, %p399_p6 }
  0x16   :  { %v499_v56 = vsub.s32 %v32_v42, %v30_v40  ;;  %v501_v57 = vsub.s32 %v33_v43, %v30_v40  ;;  %v503_v58 = vsub.s32 %v34_v45, %v30_v40  ;;  %v509_v60 = vsub.s32 %v32_v42, %v447_v20 }
  0x17   :  { %55 = vrot.lane.b32.xlu1 %v44_v3, %s422_s14  ;;  %53 = vrot.lane.b32.xlu0 %v43_v1, %s422_s14  ;;  %v518_v63 = vsub.s32 %v33_v43, %v447_v20  ;;  %vm917_vm4 = vcmp.eq.s32.totalorder %v497_v55, 0  ;;  %vm921_vm8 = vcmp.eq.s32.totalorder %v506_v59, 0  ;;  %vm923_vm12 = vcmp.eq.s32.totalorder %v506_v59, 1  ;;  %p402_p9 = pnand %p401_p8, %p395_p5 }
  0x18   :  { %vm918_vm5 = vcmp.eq.s32.totalorder %v499_v56, 0  ;;  %vm920_vm6 = vcmp.eq.s32.totalorder %v501_v57, 0  ;;  %vm919_vm7 = vcmp.eq.s32.totalorder %v503_v58, 0  ;;  %vm922_vm13 = vcmp.eq.s32.totalorder %v509_v60, 1 }
  0x19   :  { %vm926_vm9 = vcmp.eq.s32.totalorder %v497_v55, 2  ;;  %vm927_vm10 = vcmp.eq.s32.totalorder %v499_v56, 2  ;;  %vm141_vm15 = vcmp.eq.s32.totalorder %v506_v59, 3  ;;  %vm146_vm11 = vcmp.eq.s32.totalorder %v499_v56, 3 }
  0x1a   :  { %vm936_vm14 = vcmp.eq.s32.totalorder %v501_v57, 1 }
  0x1b   :  { %234 = vrot.lane.b32.xlu1 %v223_v2, %s422_s14  ;;  %232 = vrot.lane.b32.xlu0 %v222_v0, %s422_s14 }
  0x1f   :  { %61 = vrot.lane.b32.xlu1 %v44_v3, %s423_s0  ;;  %59 = vrot.lane.b32.xlu0 %v43_v1, %s423_s0 }
  0x23   :  { %240 = vrot.lane.b32.xlu1 %v223_v2, %s423_s0  ;;  %238 = vrot.lane.b32.xlu0 %v222_v0, %s423_s0 }
  0x81   :  { %v227_v4 = vpop.permute.xlu1 %226  ;;  %v48_v5 = vpop.permute.xlu0 %47 }
  0x82   :  { %v66_v13 = vsel %vm65_vm0, %v43_v1, %v48_v5  ;;  %v244_v31 = vsel %vm65_vm0, %v222_v0, %v227_v4  ;;  %v521_v0 = vsub.s32 %v34_v45, %v447_v20 }
  0x85   :  { %v229_v6 = vpop.permute.xlu1 %228  ;;  %v50_v7 = vpop.permute.xlu0 %49 }
  0x86   :  { %v67_v14 = vsel %vm65_vm0, %v44_v3, %v50_v7  ;;  %v245_v26 = vsel %vm65_vm0, %v223_v2, %v229_v6  ;;  %vm145_vm0 = vcmp.eq.s32.totalorder %v497_v55, 3 }
  0x89   :  { %v56_v8 = vpop.permute.xlu1 %55  ;;  %v54_v9 = vpop.permute.xlu0 %53 }
  0x8a   :  { %v70_v15 = vsel %vm68_vm1, %v67_v14, %v56_v8  ;;  %v69_v16 = vsel %vm68_vm1, %v66_v13, %v54_v9 }
  0x8d   :  { %v235_v10 = vpop.permute.xlu1 %234  ;;  %v233_v11 = vpop.permute.xlu0 %232 }
  0x8e   :  { %v247_v32 = vsel %vm68_vm1, %v245_v26, %v235_v10  ;;  %v246_v35 = vsel %vm68_vm1, %v244_v31, %v233_v11  ;;  %vm925_vm1 = vcmp.eq.s32.totalorder %v518_v63, 2 }
  0x91   :  { %v62_v17 = vpop.permute.xlu1 %61  ;;  %v60_v18 = vpop.permute.xlu0 %59 }
  0x92   :  { %v450_v21 = vsel %vm71_vm2, %v70_v15, %v62_v17  ;;  %v453_v22 = vsel %vm71_vm2, %v69_v16, %v60_v18 }
  0x93   :  { %v91_v23 = vrot.slane %v450_v21, 1  ;;  %v90_v24 = vrot.slane %v453_v22, 1  ;;  %v86_v19 = vsel %vm917_vm4, %v450_v21, 0.0  ;;  %v82_v26 = vsel %vm921_vm8, %v453_v22, 0.0 }
  0x94   :  { %vm197_vm8 = vcmp.eq.s32.totalorder %v506_v59, 7  ;;  %vm199_vm4 = vcmp.eq.s32.totalorder %v518_v63, 7 }
  0x95   :  { %v241_v25 = vpop.permute.xlu1 %240  ;;  %v239_v30 = vpop.permute.xlu0 %238  ;;  %v93_v33 = vsel %vm92_vm3, %v90_v24, %v91_v23  ;;  %v94_v34 = vsel %vm92_vm3, %v91_v23, %v90_v24  ;;  %v87_v23 = vsel %vm918_vm5, %v450_v21, 0.0  ;;  %v88_v24 = vsel %vm920_vm6, %v450_v21, 0.0 }
  0x96   :  { %v467_v36 = vmax.f32 %v453_v22, %v93_v33  ;;  %v470_v37 = vmax.f32 %v450_v21, %v94_v34  ;;  %v473_v38 = vsel %vm71_vm2, %v247_v32, %v241_v25  ;;  %v476_v39 = vsel %vm71_vm2, %v246_v35, %v239_v30 }
  0x97   :  { %v259_v44 = vrot.slane %v473_v38, 1  ;;  %v258_v48 = vrot.slane %v476_v39, 1  ;;  %vm924_vm2 = vcmp.eq.s32.totalorder %v521_v0, 2  ;;  %v89_v25 = vsel %vm919_vm7, %v450_v21, 0.0 }
  0x98   :  { %v113_v46 = vrot.slane %v467_v36, 1  ;;  %v114_v47 = vrot.slane %v470_v37, 1  ;;  %vm929_vm5 = vcmp.eq.s32.totalorder %v509_v60, 0  ;;  %vm930_vm7 = vcmp.eq.s32.totalorder %v518_v63, 0 }
  0x99   :  { %v260_v53 = vsel %vm92_vm3, %v258_v48, %v259_v44  ;;  %v261_v54 = vsel %vm92_vm3, %v259_v44, %v258_v48  ;;  %v83_v27 = vsel %vm929_vm5, %v453_v22, 0.0  ;;  %v84_v21 = vsel %vm930_vm7, %v453_v22, 0.0 }
  0x9a   :  { %v115_v49 = vsel %vm92_vm3, %v113_v46, %v114_v47  ;;  %v116_v50 = vsel %vm92_vm3, %v114_v47, %v113_v46  ;;  %v512_v61 = vmax.f32 %v476_v39, %v260_v53  ;;  %v515_v62 = vmax.f32 %v473_v38, %v261_v54 }
  0x9b   :  { %v488_v51 = vmax.f32 %v467_v36, %v115_v49  ;;  %v491_v52 = vmax.f32 %v470_v37, %v116_v50  ;;  %vm931_vm6 = vcmp.eq.s32.totalorder %v521_v0, 0  ;;  %v105_v33 = vsel %vm923_vm12, %v467_v36, %v82_v26 }
  0x9c   :  { %v272_v7 = vrot.slane %v512_v61, 1  ;;  %v273_v8 = vrot.slane %v515_v62, 1  ;;  %v85_v30 = vsel %vm931_vm6, %v453_v22, 0.0  ;;  %v106_v34 = vsel %vm922_vm13, %v467_v36, %v83_v27 }
  0x9d   :  { %v135_v1 = vrot.slane %v488_v51, 1  ;;  %v136_v2 = vrot.slane %v491_v52, 1  ;;  %vm932_vm7 = vcmp.eq.s32.totalorder %v518_v63, 1  ;;  %vm933_vm13 = vcmp.eq.s32.totalorder %v521_v0, 1 }
  0x9e   :  { %v274_v11 = vsel %vm92_vm3, %v272_v7, %v273_v8  ;;  %v275_v12 = vsel %vm92_vm3, %v273_v8, %v272_v7  ;;  %v107_v44 = vsel %vm932_vm7, %v467_v36, %v84_v21  ;;  %v108_v45 = vsel %vm933_vm13, %v467_v36, %v85_v30 }
  0x9f   :  { %v137_v3 = vsel %vm92_vm3, %v135_v1, %v136_v2  ;;  %v138_v4 = vsel %vm92_vm3, %v136_v2, %v135_v1  ;;  %v574_v15 = vmax.f32 %v512_v61, %v274_v11  ;;  %v577_v16 = vmax.f32 %v515_v62, %v275_v12 }
  0xa0   :  { %v536_v5 = vmax.f32 %v488_v51, %v137_v3  ;;  %v539_v6 = vmax.f32 %v491_v52, %v138_v4  ;;  %vm934_vm12 = vcmp.eq.s32.totalorder %v497_v55, 1  ;;  %vm935_vm6 = vcmp.eq.s32.totalorder %v499_v56, 1 }
  0xa1   :  { %v286_v31 = vrot.slane %v574_v15, 1  ;;  %v287_v32 = vrot.slane %v577_v16, 1  ;;  %v109_v46 = vsel %vm934_vm12, %v470_v37, %v86_v19  ;;  %v110_v47 = vsel %vm935_vm6, %v470_v37, %v87_v23 }
  0xa2   :  { %v157_v9 = vrot.slane %v536_v5, 1  ;;  %v158_v10 = vrot.slane %v539_v6, 1  ;;  %vm173_vm5 = vcmp.eq.s32.totalorder %v497_v55, 5  ;;  %v111_v36 = vsel %vm936_vm14, %v470_v37, %v88_v24 }
  0xa3   :  { %v288_v42 = vsel %vm92_vm3, %v286_v31, %v287_v32  ;;  %v289_v43 = vsel %vm92_vm3, %v287_v32, %v286_v31  ;;  %vm937_vm13 = vcmp.eq.s32.totalorder %v503_v58, 1  ;;  %vm938_vm12 = vcmp.eq.s32.totalorder %v506_v59, 2 }
  0xa4   :  { %v159_v13 = vsel %vm92_vm3, %v157_v9, %v158_v10  ;;  %v160_v14 = vsel %vm92_vm3, %v158_v10, %v157_v9  ;;  %v112_v48 = vsel %vm937_vm13, %v470_v37, %v89_v25  ;;  %v127_v49 = vsel %vm938_vm12, %v488_v51, %v105_v33 }
  0xa5   :  { %v161_v17 = vmax.f32 %v536_v5, %v159_v13  ;;  %v162_v18 = vmax.f32 %v539_v6, %v160_v14  ;;  %vm939_vm6 = vcmp.eq.s32.totalorder %v509_v60, 2  ;;  %vm198_vm7 = vcmp.eq.s32.totalorder %v509_v60, 7 }
  0xa6   :  { %v128_v50 = vsel %vm939_vm6, %v488_v51, %v106_v34  ;;  %v129_v37 = vsel %vm925_vm1, %v488_v51, %v107_v44  ;;  %v130_v53 = vsel %vm924_vm2, %v488_v51, %v108_v45  ;;  %v672_v54 = vmax.f32 %v574_v15, %v288_v42 }
  0xa7   :  { %v163_v28 = vrot.slane %v161_v17, 1  ;;  %v164_v29 = vrot.slane %v162_v18, 1  ;;  %v675_v1 = vmax.f32 %v577_v16, %v289_v43  ;;  %vm201_vm13 = vcmp.eq.s32.totalorder %v497_v55, 7 }
  0xa8   :  { %vm202_vm12 = vcmp.eq.s32.totalorder %v499_v56, 7  ;;  %vm928_vm6 = vcmp.eq.s32.totalorder %v501_v57, 7  ;;  %v131_v2 = vsel %vm926_vm9, %v491_v52, %v109_v46  ;;  %v132_v51 = vsel %vm927_vm10, %v491_v52, %v110_v47 }
  0xa9   :  { %v165_v35 = vsel %vm92_vm3, %v163_v28, %v164_v29  ;;  %v166_v22 = vsel %vm92_vm3, %v164_v29, %v163_v28  ;;  %vm940_vm2 = vcmp.eq.s32.totalorder %v501_v57, 2  ;;  %vm941_vm1 = vcmp.eq.s32.totalorder %v503_v58, 2 }
  0xaa   :  { %v167_v40 = vmax.f32 %v161_v17, %v165_v35  ;;  %v627_v41 = vmax.f32 %v162_v18, %v166_v22  ;;  %v133_v7 = vsel %vm940_vm2, %v491_v52, %v111_v36  ;;  %v134_v8 = vsel %vm941_vm1, %v491_v52, %v112_v48 }
  0xab   :  { %v149_v9 = vsel %vm141_vm15, %v536_v5, %v127_v49  ;;  %vm942_vm9 = vcmp.eq.s32.totalorder %v509_v60, 3  ;;  %vm943_vm10 = vcmp.eq.s32.totalorder %v518_v63, 3  ;;  %vm944_vm14 = vcmp.eq.s32.totalorder %v521_v0, 3 }
  0xac   :  { %v185_v3 = vrot.slane %v167_v40, 1  ;;  %v186_v4 = vrot.slane %v627_v41, 1  ;;  %v150_v10 = vsel %vm942_vm9, %v536_v5, %v128_v50  ;;  %v151_v11 = vsel %vm943_vm10, %v536_v5, %v129_v37 }
  0xad   :  { %v152_v12 = vsel %vm944_vm14, %v536_v5, %v130_v53  ;;  %v300_v18 = vrot.slane %v672_v54, 1  ;;  %v301_v19 = vrot.slane %v675_v1, 1  ;;  %v153_v23 = vsel %vm145_vm0, %v539_v6, %v131_v2 }
  0xae   :  { %v187_v13 = vsel %vm92_vm3, %v185_v3, %v186_v4  ;;  %v188_v52 = vsel %vm92_vm3, %v186_v4, %v185_v3  ;;  %v154_v5 = vsel %vm146_vm11, %v539_v6, %v132_v51  ;;  %vm945_vm9 = vcmp.eq.s32.totalorder %v501_v57, 3 }
  0xaf   :  { %v189_v14 = vmax.f32 %v167_v40, %v187_v13  ;;  %v190_v17 = vmax.f32 %v627_v41, %v188_v52  ;;  %v155_v24 = vsel %vm945_vm9, %v539_v6, %v133_v7  ;;  %vm946_vm10 = vcmp.eq.s32.totalorder %v503_v58, 3 }
  0xb0   :  { %v156_v25 = vsel %vm946_vm10, %v539_v6, %v134_v8  ;;  %v302_v28 = vsel %vm92_vm3, %v300_v18, %v301_v19  ;;  %v303_v29 = vsel %vm92_vm3, %v301_v19, %v300_v18  ;;  %vm947_vm1 = vcmp.eq.s32.totalorder %v506_v59, 5 }
  0xb1   :  { %v191_v26 = vrot.slane %v189_v14, 1  ;;  %v192_v27 = vrot.slane %v190_v17, 1  ;;  %v177_v21 = vsel %vm947_vm1, %v167_v40, %v149_v9  ;;  %vm948_vm2 = vcmp.eq.s32.totalorder %v509_v60, 5 }
  0xb2   :  { %v178_v30 = vsel %vm948_vm2, %v167_v40, %v150_v10  ;;  %v304_v31 = vmax.f32 %v672_v54, %v302_v28  ;;  %v305_v32 = vmax.f32 %v675_v1, %v303_v29  ;;  %vm949_vm14 = vcmp.eq.s32.totalorder %v518_v63, 5 }
  0xb3   :  { %v179_v6 = vsel %vm949_vm14, %v167_v40, %v151_v11  ;;  %vm950_vm9 = vcmp.eq.s32.totalorder %v521_v0, 5  ;;  %v193_v34 = vsel %vm92_vm3, %v191_v26, %v192_v27  ;;  %v194_v35 = vsel %vm92_vm3, %v192_v27, %v191_v26 }
  0xb4   :  { %v180_v33 = vsel %vm950_vm9, %v167_v40, %v152_v12  ;;  %v195_v22 = vmax.f32 %v189_v14, %v193_v34  ;;  %v196_v42 = vmax.f32 %v190_v17, %v194_v35  ;;  %v306_v43 = vrot.slane %v304_v31, 1 }
  0xb5   :  { %v307_v44 = vrot.slane %v305_v32, 1  ;;  %v181_v45 = vsel %vm173_vm5, %v627_v41, %v153_v23  ;;  %vm951_vm10 = vcmp.eq.s32.totalorder %v499_v56, 5  ;;  %vm952_vm1 = vcmp.eq.s32.totalorder %v501_v57, 5 }
  0xb6   :  { %v182_v46 = vsel %vm951_vm10, %v627_v41, %v154_v5  ;;  %v183_v40 = vsel %vm952_vm1, %v627_v41, %v155_v24  ;;  %vm953_vm2 = vcmp.eq.s32.totalorder %v503_v58, 5  ;;  %v205_v36 = vsel %vm197_vm8, %v195_v22, %v177_v21 }
  0xb7   :  { %v184_v47 = vsel %vm953_vm2, %v627_v41, %v156_v25  ;;  %v206_v48 = vsel %vm198_vm7, %v195_v22, %v178_v30  ;;  %v207_v49 = vsel %vm199_vm4, %v195_v22, %v179_v6  ;;  %vm954_vm14 = vcmp.eq.s32.totalorder %v521_v0, 7  ;;  %213 = vst [vmem:[#allocation5] sm:$0xff] %v205_v36 }
  0xb8   :  { %v208_v50 = vsel %vm954_vm14, %v195_v22, %v180_v33  ;;  %v209_v37 = vsel %vm201_vm13, %v196_v42, %v181_v45  ;;  %v210_v53 = vsel %vm202_vm12, %v196_v42, %v182_v46  ;;  %v211_v41 = vsel %vm928_vm6, %v196_v42, %v183_v40  ;;  %214 = vst [vmem:[#allocation5 + $0x8] sm:$0xff] %v206_v48 }
  0xb9   :  { %vm955_vm9 = vcmp.eq.s32.totalorder %v503_v58, 7  ;;  %215 = vst [vmem:[#allocation5 + $0x10] sm:$0xff] %v207_v49  ;;  %216 = vst [vmem:[#allocation5 + $0x18] sm:$0xff] %v208_v50  ;;  %v308_v51 = vsel %vm92_vm3, %v306_v43, %v307_v44  ;;  %v309_v3 = vsel %vm92_vm3, %v307_v44, %v306_v43  ;;  %vm956_vm10 = vcmp.eq.s32.totalorder %v497_v55, 0 }
  0xba   :  { %v212_v2 = vsel %vm955_vm9, %v196_v42, %v184_v47  ;;  %217 = vst [vmem:[#allocation5 + $0x20] sm:$0xff] %v209_v37  ;;  %218 = vst [vmem:[#allocation5 + $0x28] sm:$0xff] %v210_v53  ;;  %v310_v4 = vmax.f32 %v304_v31, %v308_v51  ;;  %v311_v7 = vmax.f32 %v305_v32, %v309_v3  ;;  %v254_v8 = vsel %vm956_vm10, %v473_v38, 0.0 }
  0xbb   :  { %219 = vst [vmem:[#allocation5 + $0x30] sm:$0xff] %v211_v41  ;;  %220 = vst [vmem:[#allocation5 + $0x38] sm:$0xff] %v212_v2  ;;  %vm957_vm1 = vcmp.eq.s32.totalorder %v499_v56, 0  ;;  %vm958_vm2 = vcmp.eq.s32.totalorder %v501_v57, 0  ;;  %vm959_vm14 = vcmp.eq.s32.totalorder %v503_v58, 0  ;;  %vm960_vm9 = vcmp.eq.s32.totalorder %v506_v59, 0 }
  0xbc   :  { %v255_v9 = vsel %vm957_vm1, %v473_v38, 0.0  ;;  %v256_v10 = vsel %vm958_vm2, %v473_v38, 0.0  ;;  %v257_v11 = vsel %vm959_vm14, %v473_v38, 0.0  ;;  %v250_v12 = vsel %vm960_vm9, %v476_v39, 0.0 }
  0xbd   :  { %vm961_vm6 = vcmp.eq.s32.totalorder %v509_v60, 0  ;;  %vm962_vm10 = vcmp.eq.s32.totalorder %v518_v63, 0  ;;  %vm963_vm1 = vcmp.eq.s32.totalorder %v521_v0, 0  ;;  %vm964_vm2 = vcmp.eq.s32.totalorder %v506_v59, 1 }
  0xbe   :  { %v251_v13 = vsel %vm961_vm6, %v476_v39, 0.0  ;;  %v252_v52 = vsel %vm962_vm10, %v476_v39, 0.0  ;;  %v253_v14 = vsel %vm963_vm1, %v476_v39, 0.0  ;;  %v264_v38 = vsel %vm964_vm2, %v512_v61, %v250_v12 }
  0xbf   :  { %vm965_vm14 = vcmp.eq.s32.totalorder %v509_v60, 1  ;;  %vm966_vm9 = vcmp.eq.s32.totalorder %v518_v63, 1  ;;  %vm967_vm6 = vcmp.eq.s32.totalorder %v521_v0, 1  ;;  %vm968_vm10 = vcmp.eq.s32.totalorder %v497_v55, 1 }
  0xc0   :  { %v265_v17 = vsel %vm965_vm14, %v512_v61, %v251_v13  ;;  %v266_v18 = vsel %vm966_vm9, %v512_v61, %v252_v52  ;;  %v267_v19 = vsel %vm967_vm6, %v512_v61, %v253_v14  ;;  %v268_v39 = vsel %vm968_vm10, %v515_v62, %v254_v8 }
  0xc1   :  { %vm969_vm1 = vcmp.eq.s32.totalorder %v499_v56, 1  ;;  %v320_v5 = vrot.slane %v310_v4, 1  ;;  %v321_v24 = vrot.slane %v311_v7, 1  ;;  %vm970_vm2 = vcmp.eq.s32.totalorder %v501_v57, 1 }
  0xc2   :  { %v269_v23 = vsel %vm969_vm1, %v515_v62, %v255_v9  ;;  %v270_v25 = vsel %vm970_vm2, %v515_v62, %v256_v10  ;;  %vm971_vm14 = vcmp.eq.s32.totalorder %v503_v58, 1  ;;  %vm972_vm9 = vcmp.eq.s32.totalorder %v506_v59, 2 }
  0xc3   :  { %v271_v26 = vsel %vm971_vm14, %v515_v62, %v257_v11  ;;  %v278_v61 = vsel %vm972_vm9, %v574_v15, %v264_v38  ;;  %vm973_vm6 = vcmp.eq.s32.totalorder %v509_v60, 2  ;;  %vm974_vm10 = vcmp.eq.s32.totalorder %v518_v63, 2 }
  0xc4   :  { %v279_v27 = vsel %vm973_vm6, %v574_v15, %v265_v17  ;;  %v280_v28 = vsel %vm974_vm10, %v574_v15, %v266_v18  ;;  %vm975_vm1 = vcmp.eq.s32.totalorder %v521_v0, 2  ;;  %v322_v21 = vsel %vm92_vm3, %v320_v5, %v321_v24 }
  0xc5   :  { %v281_v29 = vsel %vm975_vm1, %v574_v15, %v267_v19  ;;  %v323_v62 = vsel %vm92_vm3, %v321_v24, %v320_v5  ;;  %vm976_vm2 = vcmp.eq.s32.totalorder %v497_v55, 2  ;;  %vm977_vm14 = vcmp.eq.s32.totalorder %v499_v56, 2 }
  0xc6   :  { %v282_v30 = vsel %vm976_vm2, %v577_v16, %v268_v39  ;;  %v283_v31 = vsel %vm977_vm14, %v577_v16, %v269_v23  ;;  %v324_v32 = vmax.f32 %v310_v4, %v322_v21  ;;  %v325_v6 = vmax.f32 %v311_v7, %v323_v62 }
  0xc7   :  { %vm978_vm9 = vcmp.eq.s32.totalorder %v501_v57, 2  ;;  %vm979_vm6 = vcmp.eq.s32.totalorder %v503_v58, 2  ;;  %v292_v34 = vsel %vm141_vm15, %v672_v54, %v278_v61  ;;  %vm980_vm10 = vcmp.eq.s32.totalorder %v509_v60, 3 }
  0xc8   :  { %v284_v15 = vsel %vm978_vm9, %v577_v16, %v270_v25  ;;  %v285_v33 = vsel %vm979_vm6, %v577_v16, %v271_v26  ;;  %v293_v35 = vsel %vm980_vm10, %v672_v54, %v279_v27  ;;  %vm981_vm1 = vcmp.eq.s32.totalorder %v518_v63, 3 }
  0xc9   :  { %v294_v22 = vsel %vm981_vm1, %v672_v54, %v280_v28  ;;  %vm982_vm2 = vcmp.eq.s32.totalorder %v521_v0, 3  ;;  %v326_v43 = vrot.slane %v324_v32, 1  ;;  %v327_v44 = vrot.slane %v325_v6, 1 }
  0xca   :  { %v295_v42 = vsel %vm982_vm2, %v672_v54, %v281_v29  ;;  %v296_v16 = vsel %vm145_vm0, %v675_v1, %v282_v30  ;;  %v297_v45 = vsel %vm146_vm11, %v675_v1, %v283_v31  ;;  %vm983_vm15 = vcmp.eq.s32.totalorder %v501_v57, 3 }
  0xcb   :  { %v298_v46 = vsel %vm983_vm15, %v675_v1, %v284_v15  ;;  %vm984_vm14 = vcmp.eq.s32.totalorder %v503_v58, 3  ;;  %vm985_vm9 = vcmp.eq.s32.totalorder %v506_v59, 5  ;;  %vm986_vm6 = vcmp.eq.s32.totalorder %v509_v60, 5 }
  0xcc   :  { %v299_v40 = vsel %vm984_vm14, %v675_v1, %v285_v33  ;;  %v312_v54 = vsel %vm985_vm9, %v310_v4, %v292_v34  ;;  %v313_v47 = vsel %vm986_vm6, %v310_v4, %v293_v35  ;;  %v328_v36 = vsel %vm92_vm3, %v326_v43, %v327_v44 }
  0xcd   :  { %v329_v48 = vsel %vm92_vm3, %v327_v44, %v326_v43  ;;  %vm987_vm11 = vcmp.eq.s32.totalorder %v518_v63, 5  ;;  %vm988_vm0 = vcmp.eq.s32.totalorder %v521_v0, 5  ;;  %v330_v50 = vmax.f32 %v324_v32, %v328_v36 }
  0xce   :  { %v314_v49 = vsel %vm987_vm11, %v310_v4, %v294_v22  ;;  %v315_v1 = vsel %vm988_vm0, %v310_v4, %v295_v42  ;;  %v331_v37 = vmax.f32 %v325_v6, %v329_v48  ;;  %v316_v53 = vsel %vm173_vm5, %v311_v7, %v296_v16 }
  0xcf   :  { %vm989_vm10 = vcmp.eq.s32.totalorder %v499_v56, 5  ;;  %vm990_vm1 = vcmp.eq.s32.totalorder %v501_v57, 5  ;;  %vm991_vm3 = vcmp.eq.s32.totalorder %v503_v58, 5  ;;  %v332_v51 = vsel %vm197_vm8, %v330_v50, %v312_v54 }
  0xd0   :  { %v317_v41 = vsel %vm989_vm10, %v311_v7, %v297_v45  ;;  %v318_v20 = vsel %vm990_vm1, %v311_v7, %v298_v46  ;;  %v319_v2 = vsel %vm991_vm3, %v311_v7, %v299_v40  ;;  %v333_v3 = vsel %vm198_vm7, %v330_v50, %v313_v47  ;;  %341 = vst [vmem:[#allocation5 + $0x40] sm:$0xff] %v332_v51 }
  0xd1   :  { %v334_v4 = vsel %vm199_vm4, %v330_v50, %v314_v49  ;;  %vm992_vm5 = vcmp.eq.s32.totalorder %v521_v0, 7  ;;  %v336_v9 = vsel %vm201_vm13, %v331_v37, %v316_v53  ;;  %v337_v10 = vsel %vm202_vm12, %v331_v37, %v317_v41  ;;  %342 = vst [vmem:[#allocation5 + $0x48] sm:$0xff] %v333_v3 }
  0xd2   :  { %v335_v8 = vsel %vm992_vm5, %v330_v50, %v315_v1  ;;  %vm993_vm2 = vcmp.eq.s32.totalorder %v501_v57, 7  ;;  %vm994_vm8 = vcmp.eq.s32.totalorder %v503_v58, 7  ;;  %343 = vst [vmem:[#allocation5 + $0x50] sm:$0xff] %v334_v4  ;;  %345 = vst [vmem:[#allocation5 + $0x60] sm:$0xff] %v336_v9 }
  0xd3   :  { %v338_v59 = vsel %vm993_vm2, %v331_v37, %v318_v20  ;;  %v339_v60 = vsel %vm994_vm8, %v331_v37, %v319_v2  ;;  %344 = vst [vmem:[#allocation5 + $0x58] sm:$0xff] %v335_v8  ;;  %346 = vst [vmem:[#allocation5 + $0x68] sm:$0xff] %v337_v10 }
  0xd4   :  { %347 = vst [vmem:[#allocation5 + $0x70] sm:$0xff] %v338_v59  ;;  %348 = vst [vmem:[#allocation5 + $0x78] sm:$0xff] %v339_v60 }
  0xd5   :  { %405 = shalt.err (!%p402_p9)
}
  0xd6   :  { %s425_s18 = smov 512  }
  0xd7   :  { %360 = dma.vmem_to_hbm [thread:$0]  %s355_s16, 2048, %s916_s1, [#allocation4], %s425_s18, %s425_s18, %s421_s13  }
  0xd8   :  { %416 = dma.done.wait [#allocation4], 2048  }
  0xd9   :  { %417 = vsyncadd [#allocation4], 4294965248 }
  0xda   :  { %364 = vsyncpa [#allocation3], 1 }
  0xdb   :  { %365 = vsyncpa [#allocation4], 1 }

</bundles_post_ra>
